<compile_context>
chip_gen: v6e
topology: v6e:2x2x1
jax: 0.10.0
libtpu: 0.0.40
codegen_flags: <defaults>
</compile_context>

<pallas_src>
import functools

import jax
import jax.numpy as jnp
from jax.experimental import pallas as pl
from jax.experimental.pallas import tpu as pltpu


def _round_up(n, m):
    return ((n + m - 1) // m) * m


def _adapter_kernel(x_ref, w1_ref, b1_ref, w2_ref, b2_ref, g_ref, beta_ref,
                    o_ref, *, eps: float):
    # x_ref: (tile_m, dim)   w1: (dim, hdim)   b1: (1, hdim)
    # w2:   (hdim, dim)      b2: (1, dim)      g/beta: (1, dim)
    x = x_ref[...]                      # native dtype (MXU fast path)

    # fc1 + bias + relu; accumulate in f32 on the MXU.
    h = jnp.dot(x, w1_ref[...], preferred_element_type=jnp.float32)
    h = jnp.maximum(h + b1_ref[...].astype(jnp.float32), 0.0)

    # fc2 + bias + residual, all in f32.
    y = jnp.dot(h.astype(w2_ref.dtype), w2_ref[...],
                preferred_element_type=jnp.float32)
    y = y + b2_ref[...].astype(jnp.float32) + x.astype(jnp.float32)

    # LayerNorm over last dim (two-pass mean / centered variance, biased var,
    # matching torch.nn.LayerNorm with eps).
    mean = jnp.mean(y, axis=-1, keepdims=True)
    centered = y - mean
    var = jnp.mean(centered * centered, axis=-1, keepdims=True)
    inv = jax.lax.rsqrt(var + eps)
    scale = inv * g_ref[...].astype(jnp.float32)     # fold gamma into the scale
    out = centered * scale + beta_ref[...].astype(jnp.float32)

    o_ref[...] = out.astype(o_ref.dtype)


def transformer_layer_adapter(x, w1, b1, w2, b2, gamma, beta,
                              *, eps=1e-5, tile_m=256):
    """x: (..., dim). Returns the same shape/dtype as x."""
    orig_shape = x.shape
    dim = orig_shape[-1]
    hdim = w1.shape[1]
    M = 1
    for s in orig_shape[:-1]:
        M *= s

    # Row tile: big by default (fills MXU rows, amortizes per-step overhead);
    # shrink for tiny problems; keep a multiple of 16 (bf16 sublane packing).
    tile_m = max(16, min(int(tile_m), _round_up(M, 16)))
    tile_m = _round_up(tile_m, 16)
    M_pad = _round_up(M, tile_m)

    x2 = x.reshape(M, dim)
    if M_pad != M:
        x2 = jnp.pad(x2, ((0, M_pad - M), (0, 0)))

    b1_2 = b1.reshape(1, hdim)
    b2_2 = b2.reshape(1, dim)
    g_2 = gamma.reshape(1, dim)
    be_2 = beta.reshape(1, dim)

    # Rough VMEM budget: resident weights/params + double-buffered x/out tiles
    # + f32 intermediates, with 2x margin; never below the 32 MiB default.
    w_bytes = (dim * hdim + hdim * dim) * jnp.dtype(w1.dtype).itemsize
    io_bytes = 2 * 2 * tile_m * dim * jnp.dtype(x.dtype).itemsize
    tmp_bytes = tile_m * (hdim + 2 * dim) * 4
    vmem_est = 2 * (w_bytes + io_bytes + tmp_bytes)
    vmem_limit = int(min(max(vmem_est, 32 * 1024 * 1024), 120 * 1024 * 1024))

    grid = (M_pad // tile_m,)
    out = pl.pallas_call(
        functools.partial(_adapter_kernel, eps=eps),
        out_shape=jax.ShapeDtypeStruct((M_pad, dim), x.dtype),
        grid_spec=pltpu.PrefetchScalarGridSpec(
            num_scalar_prefetch=0,
            grid=grid,
            in_specs=[
                pl.BlockSpec((tile_m, dim), lambda i: (i, 0)),   # x rows
                pl.BlockSpec((dim, hdim), lambda i: (0, 0)),     # w1 (resident)
                pl.BlockSpec((1, hdim), lambda i: (0, 0)),       # b1
                pl.BlockSpec((hdim, dim), lambda i: (0, 0)),     # w2 (resident)
                pl.BlockSpec((1, dim), lambda i: (0, 0)),        # b2
                pl.BlockSpec((1, dim), lambda i: (0, 0)),        # gamma
                pl.BlockSpec((1, dim), lambda i: (0, 0)),        # beta
            ],
            out_specs=pl.BlockSpec((tile_m, dim), lambda i: (i, 0)),
        ),
        compiler_params=pltpu.CompilerParams(
            dimension_semantics=("parallel",),
            vmem_limit_bytes=vmem_limit),
    )(x2, w1, b1_2, w2, b2_2, g_2, be_2)

    if M_pad != M:
        out = out[:M]
    return out.reshape(orig_shape)


def _reference(x, w1, b1, w2, b2, gamma, beta, eps=1e-5):
    h = jnp.maximum(x @ w1 + b1, 0.0)
    y = h @ w2 + b2 + x
    mean = jnp.mean(y, axis=-1, keepdims=True)
    var = jnp.mean((y - mean) ** 2, axis=-1, keepdims=True)
    return (y - mean) * jax.lax.rsqrt(var + eps) * gamma + beta


if __name__ == "__main__":
    batch, seq, dim, hdim = 2, 24, 32, 64

    key = jax.random.PRNGKey(0)
    kx, k1, k2, k3, k4 = jax.random.split(key, 5)

    # Deterministic inits (Linear shapes: fc1 dim->hdim, fc2 hdim->dim;
    # LayerNorm gamma=1, beta=0).
    x = jax.random.normal(kx, (batch, seq, dim), dtype=jnp.float32)
    bound1 = 1.0 / (dim ** 0.5)
    bound2 = 1.0 / (hdim ** 0.5)
    w1 = jax.random.uniform(k1, (dim, hdim), jnp.float32, -bound1, bound1)
    b1 = jax.random.uniform(k2, (hdim,), jnp.float32, -bound1, bound1)
    w2 = jax.random.uniform(k3, (hdim, dim), jnp.float32, -bound2, bound2)
    b2 = jax.random.uniform(k4, (dim,), jnp.float32, -bound2, bound2)
    gamma = jnp.ones((dim,), jnp.float32)
    beta = jnp.zeros((dim,), jnp.float32)

    ref = _reference(x, w1, b1, w2, b2, gamma, beta)

    # 1) Default tile_m (clamped down to cover the small M in one tile).
    out = transformer_layer_adapter(x, w1, b1, w2, b2, gamma, beta)
    out = jax.block_until_ready(out)
    assert out.shape == (batch, seq, dim)
    assert jnp.allclose(out, ref, atol=2e-5, rtol=1e-5), "mismatch (default tile)"

    # 2) Small explicit tile_m to exercise multi-step grid + row padding path.
    out2 = transformer_layer_adapter(x, w1, b1, w2, b2, gamma, beta, tile_m=32)
    out2 = jax.block_until_ready(out2)
    assert out2.shape == (batch, seq, dim)
    assert jnp.allclose(out2, ref, atol=2e-5, rtol=1e-5), "mismatch (padded tiles)"

    print("KERNEL_OK")
</pallas_src>

<mosaic_0001>
module attributes {stable_mosaic.version = 11 : i64} {
  func.func @_adapter_kernel(%arg0: i32, %arg1: memref<48x32xf32, #tpu.memory_space<vmem>>, %arg2: memref<32x64xf32, #tpu.memory_space<vmem>>, %arg3: memref<1x64xf32, #tpu.memory_space<vmem>>, %arg4: memref<64x32xf32, #tpu.memory_space<vmem>>, %arg5: memref<1x32xf32, #tpu.memory_space<vmem>>, %arg6: memref<1x32xf32, #tpu.memory_space<vmem>>, %arg7: memref<1x32xf32, #tpu.memory_space<vmem>>, %arg8: memref<48x32xf32, #tpu.memory_space<vmem>>) attributes {dimension_semantics = [#tpu.dimension_semantics<parallel>], iteration_bounds = array<i64: 1>, scalar_prefetch = 0 : i64, scratch_operands = 0 : i64, tpu.core_type = #tpu.core_type<tc>, window_params = [{transform_indices = @transform_0, window_bounds = array<i64: 48, 32>}, {pipeline_mode = #tpu.pipeline_mode<synchronous>, transform_indices = @transform_1, window_bounds = array<i64: 32, 64>}, {pipeline_mode = #tpu.pipeline_mode<synchronous>, transform_indices = @transform_2, window_bounds = array<i64: 1, 64>}, {pipeline_mode = #tpu.pipeline_mode<synchronous>, transform_indices = @transform_3, window_bounds = array<i64: 64, 32>}, {pipeline_mode = #tpu.pipeline_mode<synchronous>, transform_indices = @transform_4, window_bounds = array<i64: 1, 32>}, {pipeline_mode = #tpu.pipeline_mode<synchronous>, transform_indices = @transform_5, window_bounds = array<i64: 1, 32>}, {pipeline_mode = #tpu.pipeline_mode<synchronous>, transform_indices = @transform_6, window_bounds = array<i64: 1, 32>}, {transform_indices = @transform_7, window_bounds = array<i64: 48, 32>}]} {
    %c0 = arith.constant 0 : index
    %c0_0 = arith.constant 0 : index
    %0 = vector.load %arg1[%c0, %c0_0] : memref<48x32xf32, #tpu.memory_space<vmem>>, vector<48x32xf32>
    %c0_1 = arith.constant 0 : index
    %c0_2 = arith.constant 0 : index
    %1 = vector.load %arg2[%c0_1, %c0_2] : memref<32x64xf32, #tpu.memory_space<vmem>>, vector<32x64xf32>
    %cst = arith.constant dense<0.000000e+00> : vector<48x64xf32>
    %2 = tpu.matmul %0, %1, %cst {dimension_numbers = #tpu.dot_dimension_numbers<[1], [0], [0], [1], [0, 0, 1, 1], [], []>} : vector<48x32xf32>, vector<32x64xf32>, vector<48x64xf32> -> vector<48x64xf32>
    %c0_3 = arith.constant 0 : index
    %c0_4 = arith.constant 0 : index
    %3 = vector.load %arg3[%c0_3, %c0_4] : memref<1x64xf32, #tpu.memory_space<vmem>>, vector<1x64xf32>
    %4 = vector.broadcast %3 : vector<1x64xf32> to vector<48x64xf32>
    %5 = arith.addf %2, %4 : vector<48x64xf32>
    %cst_5 = arith.constant 0.000000e+00 : f32
    %6 = vector.broadcast %cst_5 : f32 to vector<48x64xf32>
    %7 = arith.maximumf %5, %6 : vector<48x64xf32>
    %c0_6 = arith.constant 0 : index
    %c0_7 = arith.constant 0 : index
    %8 = vector.load %arg4[%c0_6, %c0_7] : memref<64x32xf32, #tpu.memory_space<vmem>>, vector<64x32xf32>
    %cst_8 = arith.constant dense<0.000000e+00> : vector<48x32xf32>
    %9 = tpu.matmul %7, %8, %cst_8 {dimension_numbers = #tpu.dot_dimension_numbers<[1], [0], [0], [1], [0, 0, 1, 1], [], []>} : vector<48x64xf32>, vector<64x32xf32>, vector<48x32xf32> -> vector<48x32xf32>
    %c0_9 = arith.constant 0 : index
    %c0_10 = arith.constant 0 : index
    %10 = vector.load %arg5[%c0_9, %c0_10] : memref<1x32xf32, #tpu.memory_space<vmem>>, vector<1x32xf32>
    %11 = vector.broadcast %10 : vector<1x32xf32> to vector<48x32xf32>
    %12 = arith.addf %9, %11 : vector<48x32xf32>
    %13 = arith.addf %12, %0 : vector<48x32xf32>
    %cst_11 = arith.constant dense<0.000000e+00> : vector<48xf32>
    %14 = vector.multi_reduction <add>, %13, %cst_11 [1] : vector<48x32xf32> to vector<48xf32>
    %15 = vector.shape_cast %14 : vector<48xf32> to vector<48x1xf32>
    %cst_12 = arith.constant 3.200000e+01 : f32
    %16 = vector.broadcast %cst_12 : f32 to vector<48x1xf32>
    %17 = arith.divf %15, %16 : vector<48x1xf32>
    %18 = vector.broadcast %17 : vector<48x1xf32> to vector<48x32xf32>
    %19 = arith.subf %13, %18 : vector<48x32xf32>
    %20 = arith.mulf %19, %19 : vector<48x32xf32>
    %cst_13 = arith.constant dense<0.000000e+00> : vector<48xf32>
    %21 = vector.multi_reduction <add>, %20, %cst_13 [1] : vector<48x32xf32> to vector<48xf32>
    %22 = vector.shape_cast %21 : vector<48xf32> to vector<48x1xf32>
    %cst_14 = arith.constant 3.200000e+01 : f32
    %23 = vector.broadcast %cst_14 : f32 to vector<48x1xf32>
    %24 = arith.divf %22, %23 : vector<48x1xf32>
    %cst_15 = arith.constant 9.99999974E-6 : f32
    %25 = vector.broadcast %cst_15 : f32 to vector<48x1xf32>
    %26 = arith.addf %24, %25 : vector<48x1xf32>
    %27 = math.rsqrt %26 : vector<48x1xf32>
    %c0_16 = arith.constant 0 : index
    %c0_17 = arith.constant 0 : index
    %28 = vector.load %arg6[%c0_16, %c0_17] : memref<1x32xf32, #tpu.memory_space<vmem>>, vector<1x32xf32>
    %29 = vector.broadcast %27 : vector<48x1xf32> to vector<48x32xf32>
    %30 = vector.broadcast %28 : vector<1x32xf32> to vector<48x32xf32>
    %31 = arith.mulf %29, %30 : vector<48x32xf32>
    %32 = arith.mulf %19, %31 : vector<48x32xf32>
    %c0_18 = arith.constant 0 : index
    %c0_19 = arith.constant 0 : index
    %33 = vector.load %arg7[%c0_18, %c0_19] : memref<1x32xf32, #tpu.memory_space<vmem>>, vector<1x32xf32>
    %34 = vector.broadcast %33 : vector<1x32xf32> to vector<48x32xf32>
    %35 = arith.addf %32, %34 : vector<48x32xf32>
    %c0_20 = arith.constant 0 : index
    %c0_21 = arith.constant 0 : index
    %36 = vector.load %arg8[%c0_20, %c0_21] : memref<48x32xf32, #tpu.memory_space<vmem>>, vector<48x32xf32>
    tpu.vector_store %arg8[%c0_20, %c0_21], %35 {strides = array<i32>} : memref<48x32xf32, #tpu.memory_space<vmem>>, vector<48x32xf32>,
    return
  }
  func.func @transform_0(%arg0: i32) -> (i32, i32) {
    %c0_i32 = arith.constant 0 : i32
    %c0_i32_0 = arith.constant 0 : i32
    return %arg0, %c0_i32 : i32, i32
  }
  func.func @transform_1(%arg0: i32) -> (i32, i32) {
    %c0_i32 = arith.constant 0 : i32
    %c0_i32_0 = arith.constant 0 : i32
    %c0_i32_1 = arith.constant 0 : i32
    return %c0_i32, %c0_i32_0 : i32, i32
  }
  func.func @transform_2(%arg0: i32) -> (i32, i32) {
    %c0_i32 = arith.constant 0 : i32
    %c0_i32_0 = arith.constant 0 : i32
    %c0_i32_1 = arith.constant 0 : i32
    return %c0_i32, %c0_i32_0 : i32, i32
  }
  func.func @transform_3(%arg0: i32) -> (i32, i32) {
    %c0_i32 = arith.constant 0 : i32
    %c0_i32_0 = arith.constant 0 : i32
    %c0_i32_1 = arith.constant 0 : i32
    return %c0_i32, %c0_i32_0 : i32, i32
  }
  func.func @transform_4(%arg0: i32) -> (i32, i32) {
    %c0_i32 = arith.constant 0 : i32
    %c0_i32_0 = arith.constant 0 : i32
    %c0_i32_1 = arith.constant 0 : i32
    return %c0_i32, %c0_i32_0 : i32, i32
  }
  func.func @transform_5(%arg0: i32) -> (i32, i32) {
    %c0_i32 = arith.constant 0 : i32
    %c0_i32_0 = arith.constant 0 : i32
    %c0_i32_1 = arith.constant 0 : i32
    return %c0_i32, %c0_i32_0 : i32, i32
  }
  func.func @transform_6(%arg0: i32) -> (i32, i32) {
    %c0_i32 = arith.constant 0 : i32
    %c0_i32_0 = arith.constant 0 : i32
    %c0_i32_1 = arith.constant 0 : i32
    return %c0_i32, %c0_i32_0 : i32, i32
  }
  func.func @transform_7(%arg0: i32) -> (i32, i32) {
    %c0_i32 = arith.constant 0 : i32
    %c0_i32_0 = arith.constant 0 : i32
    return %arg0, %c0_i32 : i32, i32
  }
}

</mosaic_0001>

<bundles_post_ra>
// kernel: tpu_custom_call.1
= control target key start
LH: loop header
LB: loop body
LE: loop exit
PB: predicated region body
PF: predicated region fallthrough
CT: control target
= control target key end

     0   :  { %vm43_vm0 = vcmask 261120   ;;  %vm178_vm1 = vcmask 523264   ;;  %s706_s1 = inlined_call_operand.vmem [shape: f32[32,64], index: 1, kind: input, shape index: {}]   ;;  %s707_s0 = inlined_call_operand.vmem [shape: f32[48,32], index: 0, kind: input, shape index: {}]   ;;  %s708_s3 = inlined_call_operand.vmem [shape: f32[64,32], index: 3, kind: input, shape index: {}]   ;;  %s709_s2 = inlined_call_operand.vmem [shape: f32[1,64], index: 2, kind: input, shape index: {}]   ;;  %s710_s4 = inlined_call_operand.vmem [shape: f32[1,32], index: 4, kind: input, shape index: {}]   ;;  %s711_s5 = inlined_call_operand.vmem [shape: f32[1,32], index: 5, kind: input, shape index: {}]   ;;  %s712_s6 = inlined_call_operand.vmem [shape: f32[1,32], index: 6, kind: input, shape index: {}]   ;;  %s713_s7 = inlined_call_operand.vmem [shape: f32[48,32], index: 7, kind: output, shape index: {}]  }
   0x1   :  { %v35_v0 = vld [vmem:[%s706_s1 + $0x18] sm:$0xff]  ;;  %v34_v1 = vld [vmem:[%s706_s1 + $0x10] sm:$0xff]  ;;  %v556_v2 = vld [vmem:[%s707_s0] sm:$0xff] }
   0x2   :  { %453 = vmatprep.subr.mxu0 %v35_v0  ;;  %v33_v3 = vld [vmem:[%s706_s1 + $0x8] sm:$0xff]  ;;  %461 = vmatprep.mubr.msk.f32.mxu0 %vm43_vm0, %v556_v2  ;;  %v170_v4 = vld [vmem:[%s708_s3 + $0x38] sm:$0xff]  ;;  %v169_v5 = vld [vmem:[%s708_s3 + $0x30] sm:$0xff] }
   0x3   :  { %454 = vmatpush3.msra.mxu0 %v35_v0  ;;  %v32_v6 = vld [vmem:[%s706_s1] sm:$0xff]  ;;  %470 = vmatprep.subr.mxu1 %v170_v4  ;;  %v168_v7 = vld [vmem:[%s708_s3 + $0x28] sm:$0xff]  ;;  %v583_v9 = vld [vmem:[%s707_s0 + $0x10] sm:$0xff] }
   0x4   :  { %455 = vmatprep.subr.mxu0 %v34_v1  ;;  %471 = vmatpush3.msra.mxu1 %v170_v4  ;;  %v578_v8 = vld [vmem:[%s707_s0 + $0x8] sm:$0xff]  ;;  %v167_v10 = vld [vmem:[%s708_s3 + $0x20] sm:$0xff]  ;;  %v29_v11 = vld [vmem:[%s707_s0 + $0x18] sm:$0xff] }
   0x5   :  { %456 = vmatpush3.msra.mxu0 %v34_v1  ;;  %472 = vmatprep.subr.mxu1 %v169_v5  ;;  %v598_v12 = vld [vmem:[%s707_s0 + $0x20] sm:$0xff]  ;;  %v606_v13 = vld [vmem:[%s707_s0 + $0x28] sm:$0xff]  ;;  %v166_v14 = vld [vmem:[%s708_s3 + $0x18] sm:$0xff] }
   0x6   :  { %457 = vmatprep.subr.mxu0 %v33_v3  ;;  %473 = vmatpush3.msra.mxu1 %v169_v5  ;;  %v165_v15 = vld [vmem:[%s708_s3 + $0x10] sm:$0xff]  ;;  %v164_v16 = vld [vmem:[%s708_s3 + $0x8] sm:$0xff]  ;;  %v163_v17 = vld [vmem:[%s708_s3] sm:$0xff] }
   0x7   :  { %458 = vmatpush3.msra.mxu0 %v33_v3  ;;  %474 = vmatprep.subr.mxu1 %v168_v7  ;;  %v413_v18 = vld [vmem:[%s709_s2] ss:$0 sm:$0xff] }
   0x8   :  { %459 = vmatprep.subr.mxu0 %v32_v6  ;;  %475 = vmatpush3.msra.mxu1 %v168_v7  ;;  %v420_v37 = vld [vmem:[%s710_s4] ss:$0 sm:$0xff] }
   0x9   :  { %460 = vmatpush3.msra.mxu0 %v32_v6  ;;  %476 = vmatprep.subr.mxu1 %v167_v10 }
   0xa   :  { %462 = vmatmul.mubr.msk.f32.vlgmr.msra.gmra.mxu0 %vm43_vm0, %v578_v8  ;;  %477 = vmatpush3.msra.mxu1 %v167_v10 }
   0xb   :  { %464 = vmatprep.mubr.msk.f32.mxu0 %vm43_vm0, %v583_v9  ;;  %478 = vmatprep.subr.mxu1 %v166_v14 }
   0xc   :  { %479 = vmatpush3.msra.mxu1 %v166_v14 }
   0xd   :  { %480 = vmatprep.subr.mxu1 %v165_v15 }
   0xe   :  { %465 = vmatmul.mubr.msk.f32.gmra.mxu0 %vm43_vm0, %v29_v11  ;;  %481 = vmatpush3.msra.mxu1 %v165_v15 }
   0xf   :  { %467 = vmatprep.mubr.msk.f32.mxu0 %vm43_vm0, %v598_v12  ;;  %482 = vmatprep.subr.mxu1 %v164_v16 }
  0x10   :  { %483 = vmatpush3.msra.mxu1 %v164_v16 }
  0x11   :  { %484 = vmatprep.subr.mxu1 %v163_v17 }
  0x12   :  { %468 = vmatmul.mubr.msk.f32.gmra.mxu0 %vm43_vm0, %v606_v13  ;;  %485 = vmatpush3.msra.mxu1 %v163_v17 }
  0xca   :  { %v463_v19 = vpop.f32.mrf.mxu0 }
  0xcb   :  { %v134_v20 = vadd.f32 %v463_v19, %v413_v18 }
  0xcc   :  { %v128_v21 = vpop.f32.mrf.mxu0 }
  0xcd   :  { %v129_v22 = vadd.f32 %v413_v18, %v128_v21  ;;  %v158_v25 = vmax.f32 %v134_v20, 0.0 }
  0xce   :  { %v466_v23 = vpop.f32.mrf.mxu0 }
  0xcf   :  { %v157_v24 = vmax.f32 %v129_v22, 0.0  ;;  %v144_v26 = vadd.f32 %v466_v23, %v413_v18 }
  0xd0   :  { %v138_v27 = vpop.f32.mrf.mxu0 }
  0xd1   :  { %v139_v28 = vadd.f32 %v413_v18, %v138_v27  ;;  %486 = vmatprep.mubr.msk.f32.mxu1 %vm178_vm1, %v157_v24  ;;  %v160_v32 = vmax.f32 %v144_v26, 0.0 }
  0xd2   :  { %v469_v29 = vpop.f32.mrf.mxu0  ;;  %487 = vmatmul.mubr.msk.f32.vlgmr.msra.gmra.mxu1 %vm178_vm1, %v158_v25 }
  0xd3   :  { %v159_v30 = vmax.f32 %v139_v28, 0.0  ;;  %v154_v31 = vadd.f32 %v469_v29, %v413_v18 }
  0xd4   :  { %v148_v33 = vpop.f32.mrf.mxu0 }
  0xd5   :  { %v149_v34 = vadd.f32 %v413_v18, %v148_v33  ;;  %489 = vmatprep.mubr.msk.f32.mxu1 %vm178_vm1, %v159_v30  ;;  %v162_v35 = vmax.f32 %v154_v31, 0.0 }
  0xd6   :  { %490 = vmatmul.mubr.msk.f32.gmra.mxu1 %vm178_vm1, %v160_v32 }
  0xd7   :  { %v161_v36 = vmax.f32 %v149_v34, 0.0 }
  0xd9   :  { %492 = vmatprep.mubr.msk.f32.mxu1 %vm178_vm1, %v161_v36 }
  0xda   :  { %493 = vmatmul.mubr.msk.f32.gmra.mxu1 %vm178_vm1, %v162_v35 }
 0x192   :  { %v488_v38 = vpop.f32.mrf.mxu1 }
 0x193   :  { %v269_v39 = vadd.f32 %v488_v38, %v420_v37 }
 0x194   :  { %v263_v40 = vpop.f32.mrf.mxu1 }
 0x195   :  { %v264_v41 = vadd.f32 %v420_v37, %v263_v40  ;;  %v293_v42 = vadd.f32 %v269_v39, %v578_v8 }
 0x196   :  { %v491_v43 = vpop.f32.mrf.mxu1 }
 0x197   :  { %v279_v44 = vadd.f32 %v491_v43, %v420_v37  ;;  %v301_v45 = vsel %vm43_vm0, %v293_v42, 0.0  ;;  %v292_v46 = vadd.f32 %v264_v41, %v556_v2 }
 0x198   :  { %302 = vadd.xlane.f32.xlu0 %v301_v45  ;;  %v273_v47 = vpop.f32.mrf.mxu1 }
 0x199   :  { %v274_v48 = vadd.f32 %v420_v37, %v273_v47  ;;  %v295_v49 = vadd.f32 %v279_v44, %v29_v11  ;;  %v298_v53 = vsel %vm43_vm0, %v292_v46, 0.0 }
 0x19a   :  { %v494_v50 = vpop.f32.mrf.mxu1 }
 0x19b   :  { %v289_v51 = vadd.f32 %v494_v50, %v420_v37  ;;  %v307_v52 = vsel %vm43_vm0, %v295_v49, 0.0  ;;  %v294_v54 = vadd.f32 %v274_v48, %v583_v9 }
 0x19c   :  { %308 = vadd.xlane.f32.xlu1 %v307_v52  ;;  %v283_v55 = vpop.f32.mrf.mxu1  ;;  %299 = vadd.xlane.f32.xlu0 %v298_v53 }
 0x19d   :  { %v284_v56 = vadd.f32 %v420_v37, %v283_v55  ;;  %v304_v57 = vsel %vm43_vm0, %v294_v54, 0.0  ;;  %v297_v59 = vadd.f32 %v289_v51, %v606_v13 }
 0x19f   :  { %v296_v58 = vadd.f32 %v284_v56, %v598_v12  ;;  %v313_v61 = vsel %vm43_vm0, %v297_v59, 0.0 }
 0x1a0   :  { %305 = vadd.xlane.f32.xlu1 %v304_v57 }
 0x1a1   :  { %v310_v60 = vsel %vm43_vm0, %v296_v58, 0.0 }
 0x1a2   :  { %311 = vadd.xlane.f32.xlu0 %v310_v60 }
 0x1a4   :  { %314 = vadd.xlane.f32.xlu1 %v313_v61 }
 0x221   :  { %v303_v62 = vpop.xlane.xlu0 %302 }
 0x222   :  { %v318_v63 = vmul.f32 0.03125, %v303_v62 }
 0x224   :  { %v645_v0 = vsub.f32 %v293_v42, %v318_v63 }
 0x225   :  { %v309_v1 = vpop.xlane.xlu1 %308  ;;  %v300_v2 = vpop.xlane.xlu0 %299 }
 0x226   :  { %v320_v3 = vmul.f32 0.03125, %v309_v1  ;;  %v317_v4 = vmul.f32 0.03125, %v300_v2  ;;  %v330_v5 = vmul.f32 %v645_v0, %v645_v0 }
 0x228   :  { %v649_v6 = vsub.f32 %v295_v49, %v320_v3  ;;  %v651_v7 = vsub.f32 %v292_v46, %v317_v4  ;;  %v338_v8 = vsel %vm43_vm0, %v330_v5, 0.0  ;;  %v427_v46 = vld [vmem:[%s711_s5] ss:$0 sm:$0xff] }
 0x229   :  { %339 = vadd.xlane.f32.xlu1 %v338_v8  ;;  %v306_v9 = vpop.xlane.xlu1 %305  ;;  %v428_v49 = vld [vmem:[%s712_s6] ss:$0 sm:$0xff] }
 0x22a   :  { %v319_v10 = vmul.f32 0.03125, %v306_v9  ;;  %v332_v11 = vmul.f32 %v649_v6, %v649_v6  ;;  %v329_v12 = vmul.f32 %v651_v7, %v651_v7 }
 0x22b   :  { %v312_v13 = vpop.xlane.xlu0 %311 }
 0x22c   :  { %v658_v14 = vsub.f32 %v294_v54, %v319_v10  ;;  %v321_v15 = vmul.f32 0.03125, %v312_v13  ;;  %v344_v16 = vsel %vm43_vm0, %v332_v11, 0.0  ;;  %v335_v17 = vsel %vm43_vm0, %v329_v12, 0.0 }
 0x22d   :  { %345 = vadd.xlane.f32.xlu1 %v344_v16  ;;  %v315_v18 = vpop.xlane.xlu1 %314  ;;  %336 = vadd.xlane.f32.xlu0 %v335_v17 }
 0x22e   :  { %v662_v19 = vsub.f32 %v296_v58, %v321_v15  ;;  %v322_v20 = vmul.f32 0.03125, %v315_v18  ;;  %v331_v21 = vmul.f32 %v658_v14, %v658_v14 }
 0x230   :  { %v328_v22 = vsub.f32 %v297_v59, %v322_v20  ;;  %v341_v23 = vsel %vm43_vm0, %v331_v21, 0.0  ;;  %v333_v24 = vmul.f32 %v662_v19, %v662_v19 }
 0x231   :  { %342 = vadd.xlane.f32.xlu0 %v341_v23 }
 0x232   :  { %v334_v25 = vmul.f32 %v328_v22, %v328_v22  ;;  %v347_v27 = vsel %vm43_vm0, %v333_v24, 0.0 }
 0x234   :  { %v350_v26 = vsel %vm43_vm0, %v334_v25, 0.0 }
 0x235   :  { %351 = vadd.xlane.f32.xlu1 %v350_v26  ;;  %348 = vadd.xlane.f32.xlu0 %v347_v27 }
 0x2b2   :  { %v340_v28 = vpop.xlane.xlu1 %339 }
 0x2b3   :  { %v354_v29 = vmul.f32 0.03125, %v340_v28 }
 0x2b5   :  { %v360_v30 = vadd.f32 1e-05, %v354_v29 }
 0x2b6   :  { %v346_v31 = vpop.xlane.xlu1 %345  ;;  %v337_v32 = vpop.xlane.xlu0 %336 }
 0x2b7   :  { %495 = vrsqrt.f32 %v360_v30  ;;  %v356_v33 = vmul.f32 0.03125, %v346_v31  ;;  %v353_v34 = vmul.f32 0.03125, %v337_v32 }
 0x2b9   :  { %v362_v35 = vadd.f32 1e-05, %v356_v33  ;;  %v359_v36 = vadd.f32 1e-05, %v353_v34 }
 0x2ba   :  { %v343_v37 = vpop.xlane.xlu0 %342 }
 0x2bb   :  { %497 = vrsqrt.f32 %v362_v35  ;;  %v355_v38 = vmul.f32 0.03125, %v343_v37 }
 0x2bc   :  { %499 = vrsqrt.f32 %v359_v36 }
 0x2bd   :  { %v361_v39 = vadd.f32 1e-05, %v355_v38 }
 0x2be   :  { %v352_v40 = vpop.xlane.xlu1 %351  ;;  %v349_v41 = vpop.xlane.xlu0 %348 }
 0x2bf   :  { %501 = vrsqrt.f32 %v361_v39  ;;  %v358_v42 = vmul.f32 0.03125, %v352_v40  ;;  %v357_v43 = vmul.f32 0.03125, %v349_v41 }
 0x2c1   :  { %v364_v44 = vadd.f32 1e-05, %v358_v42  ;;  %v363_v45 = vadd.f32 1e-05, %v357_v43 }
 0x2c3   :  { %503 = vrsqrt.f32 %v364_v44 }
 0x2c4   :  { %v496_v47 = vpop.eup %495  ;;  %505 = vrsqrt.f32 %v363_v45 }
 0x2c5   :  { %v379_v48 = vmul.f32 %v496_v47, %v427_v46 }
 0x2c7   :  { %v385_v50 = vmul.f32 %v379_v48, %v645_v0 }
 0x2c8   :  { %v498_v51 = vpop.eup %497 }
 0x2c9   :  { %v500_v52 = vpop.eup %499  ;;  %v398_v53 = vadd.f32 %v428_v49, %v385_v50  ;;  %v381_v54 = vmul.f32 %v498_v51, %v427_v46 }
 0x2ca   :  { %v378_v55 = vmul.f32 %v500_v52, %v427_v46 }
 0x2cb   :  { %404 = vst.msk [vmem:[%s713_s7 + $0x8] sm:$0xff] %vm43_vm0, %v398_v53  ;;  %v387_v56 = vmul.f32 %v381_v54, %v649_v6 }
 0x2cc   :  { %v502_v57 = vpop.eup %501  ;;  %v384_v58 = vmul.f32 %v378_v55, %v651_v7 }
 0x2cd   :  { %v400_v59 = vadd.f32 %v428_v49, %v387_v56  ;;  %v380_v60 = vmul.f32 %v502_v57, %v427_v46 }
 0x2ce   :  { %v397_v61 = vadd.f32 %v428_v49, %v384_v58 }
 0x2cf   :  { %406 = vst.msk [vmem:[%s713_s7 + $0x18] sm:$0xff] %vm43_vm0, %v400_v59  ;;  %v386_v62 = vmul.f32 %v380_v60, %v658_v14 }
 0x2d0   :  { %v504_v63 = vpop.eup %503  ;;  %403 = vst.msk [vmem:[%s713_s7] sm:$0xff] %vm43_vm0, %v397_v61 }
 0x2d1   :  { %v506_v0 = vpop.eup %505  ;;  %v399_v1 = vadd.f32 %v428_v49, %v386_v62  ;;  %v383_v2 = vmul.f32 %v504_v63, %v427_v46 }
 0x2d2   :  { %v382_v3 = vmul.f32 %v506_v0, %v427_v46 }
 0x2d3   :  { %405 = vst.msk [vmem:[%s713_s7 + $0x10] sm:$0xff] %vm43_vm0, %v399_v1  ;;  %v389_v4 = vmul.f32 %v383_v2, %v328_v22 }
 0x2d4   :  { %v388_v5 = vmul.f32 %v382_v3, %v662_v19 }
 0x2d5   :  { %v402_v6 = vadd.f32 %v428_v49, %v389_v4 }
 0x2d6   :  { %v401_v7 = vadd.f32 %v428_v49, %v388_v5 }
 0x2d7   :  { %408 = vst.msk [vmem:[%s713_s7 + $0x28] sm:$0xff] %vm43_vm0, %v402_v6 }
 0x2d8   :  { %407 = vst.msk [vmem:[%s713_s7 + $0x20] sm:$0xff] %vm43_vm0, %v401_v7 }

</bundles_post_ra>
